<compile_context>
chip_gen: v5e
topology: v5e:2x2
jax: 0.10.0
libtpu: 0.0.40
codegen_flags: <defaults>
</compile_context>

<pallas_src>
import functools

import jax
import jax.numpy as jnp
from jax.experimental import pallas as pl
from jax.experimental.pallas import tpu as pltpu


_LANE_CHOICES = (8192, 4096, 2048, 1024, 512, 256, 128)


def _per_chip_block_bytes():
    """Block-byte target per in/out block buffer, chosen per TPU generation."""
    try:
        kind = jax.devices()[0].device_kind.lower()
    except Exception:  # pragma: no cover - defensive
        kind = ""
    if "v7" in kind:
        # ~3.2 TB/s HBM: big blocks amortize the ~0.35 us per-grid-step cost.
        # 8 MiB x (in+out) x 2 buffers = 32 MiB; scoped limit raised below.
        return 8 << 20
    if "v6" in kind:
        return 4 << 20
    # v5e (16 MiB default scoped VMEM, ~0.8 TB/s HBM) and unknown chips.
    return 2 << 20


def _myfloor_kernel(params_ref, x_ref, o_ref, *, t):
    # params_ref: (2,) f32 in SMEM -> [scale = t/up, inv_scale = up/t]
    scale = params_ref[0]
    inv_scale = params_ref[1]
    x = x_ref[...]
    # clamp(floor(x * t / up), 0, t) * (up/t)
    #   == clamp(floor((x/up)*t)/t, 0, 1) * up   (the PyTorch MyFloor forward)
    # f32 upcast before floor is intentional (bf16 floor can mis-bin near edges,
    # and v5e has no bf16 VPU).
    y = jnp.floor(x.astype(jnp.float32) * scale)
    y = jnp.clip(y, 0.0, jnp.float32(t))
    o_ref[...] = (y * inv_scale).astype(o_ref.dtype)


def _myfloor_xla(x, up, t):
    # Literal PyTorch MyFloor.forward order (used for tiny tails / reference).
    x = x / up
    x = jnp.floor(x * t) / t
    x = jnp.clip(x, 0.0, 1.0)
    return x * up


def myfloor_forward(x, up, t=8):
    """Elementwise MyFloor forward. x: any float array (e.g. NCHW), up: scalar param."""
    orig_shape = x.shape
    orig_dtype = x.dtype
    total = int(x.size)
    itemsize = jnp.dtype(orig_dtype).itemsize

    up_f = jnp.asarray(up, dtype=jnp.float32).reshape(())

    # Lane-dense factorization (rows, lane): lane a large multiple of 128.
    lane = None
    for cand in _LANE_CHOICES:
        if total % cand == 0:
            lane = cand
            break

    x_flat = x.reshape(-1)
    if lane is None:
        # Ragged size: run the kernel on the 128-aligned bulk; plain XLA handles
        # the tiny (<128 elem) tail. No pad + post-slice HBM round trips.
        lane = 128
        bulk = (total // lane) * lane
        tail = total - bulk
        if bulk == 0:
            return _myfloor_xla(x_flat, up_f, t).astype(orig_dtype).reshape(orig_shape)
    else:
        bulk, tail = total, 0

    rows = bulk // lane
    x2d = (x_flat[:bulk] if tail else x_flat).reshape(rows, lane)

    # Sublane packing multiple: 8 for 4-byte, 16 for 2-byte, 32 for 1-byte dtypes.
    sub = max(8, 32 // itemsize)
    target_bytes = _per_chip_block_bytes()
    tr = max(sub, (target_bytes // (lane * itemsize)) // sub * sub)
    if tr >= rows:
        tr = rows
        # Keep >=2 grid blocks for non-trivial tensors so the grid can be
        # sharded across v7x's two TensorCores and the DMAs double-buffer.
        if rows >= 2 * sub:
            tr = ((pl.cdiv(rows, 2) + sub - 1) // sub) * sub
    num_blocks = pl.cdiv(rows, tr)

    # Fold the two divides into precomputed scalars, read once per block from SMEM.
    params = jnp.stack([jnp.float32(t) / up_f, up_f / jnp.float32(t)])

    # Raise the scoped-VMEM limit only if the double-buffered in+out footprint
    # could exceed the smallest per-chip default (16 MiB on v5e); cap well under
    # v7x's 64 MiB physical VMEM.
    footprint = 4 * tr * lane * itemsize  # (in + out) x 2 pipeline buffers
    compiler_kwargs = dict(dimension_semantics=("parallel",))
    if footprint > (12 << 20):
        compiler_kwargs["vmem_limit_bytes"] = min(footprint + (8 << 20), 48 << 20)

    kernel = functools.partial(_myfloor_kernel, t=t)

    out2d = pl.pallas_call(
        kernel,
        out_shape=jax.ShapeDtypeStruct((rows, lane), orig_dtype),
        grid=(num_blocks,),
        in_specs=[
            pl.BlockSpec(memory_space=pltpu.SMEM),        # [scale, inv_scale]
            pl.BlockSpec((tr, lane), lambda i: (i, 0)),   # x tile
        ],
        out_specs=pl.BlockSpec((tr, lane), lambda i: (i, 0)),
        compiler_params=pltpu.CompilerParams(**compiler_kwargs),
        cost_estimate=pl.CostEstimate(
            flops=3 * bulk,
            transcendentals=0,
            bytes_accessed=2 * bulk * itemsize,
        ),
    )(params, x2d)

    out_flat = out2d.reshape(-1)
    if tail:
        out_tail = _myfloor_xla(x_flat[bulk:], up_f, t).astype(orig_dtype)
        out_flat = jnp.concatenate([out_flat, out_tail])
    return out_flat.reshape(orig_shape)


if __name__ == "__main__":
    # Deterministic parameter init matching MyFloor.__init__(up=8.0, t=8)
    up_param = jnp.array([8.0], dtype=jnp.float32)  # nn.Parameter([8.0])
    t = 8

    key = jax.random.PRNGKey(0)
    # Small NCHW input consistent with a CIFAR-style conv activation
    x = jax.random.uniform(
        key, (2, 4, 16, 16), dtype=jnp.float32, minval=-2.0, maxval=10.0
    )

    out = myfloor_forward(x, up_param, t=t)
    out = jax.block_until_ready(out)

    ref = _myfloor_xla(x, up_param[0], t)
    assert out.shape == x.shape, (out.shape, x.shape)
    assert out.dtype == x.dtype, (out.dtype, x.dtype)
    assert jnp.allclose(out, ref, atol=1e-5, rtol=1e-5), "mismatch vs reference"

    print("KERNEL_OK")
</pallas_src>

<mosaic_0001>
module attributes {stable_mosaic.version = 11 : i64} {
  func.func @_myfloor_kernel(%arg0: i32, %arg1: memref<2xf32, #tpu.memory_space<smem>>, %arg2: memref<1x2048xf32, #tpu.memory_space<vmem>>, %arg3: memref<1x2048xf32, #tpu.memory_space<vmem>>) attributes {dimension_semantics = [#tpu.dimension_semantics<parallel>], iteration_bounds = array<i64: 1>, scalar_prefetch = 0 : i64, scratch_operands = 0 : i64, tpu.core_type = #tpu.core_type<tc>, window_params = [{transform_indices = @transform_0, window_bounds = array<i64: 2>}, {transform_indices = @transform_1, window_bounds = array<i64: 1, 2048>}, {transform_indices = @transform_2, window_bounds = array<i64: 1, 2048>}]} {
    %c0 = arith.constant 0 : index
    %0 = memref.load %arg1[%c0] : memref<2xf32, #tpu.memory_space<smem>>
    %c1 = arith.constant 1 : index
    %1 = memref.load %arg1[%c1] : memref<2xf32, #tpu.memory_space<smem>>
    %c0_0 = arith.constant 0 : index
    %c0_1 = arith.constant 0 : index
    %2 = vector.load %arg2[%c0_0, %c0_1] : memref<1x2048xf32, #tpu.memory_space<vmem>>, vector<1x2048xf32>
    %3 = vector.broadcast %0 : f32 to vector<1x2048xf32>
    %4 = arith.mulf %2, %3 : vector<1x2048xf32>
    %5 = math.floor %4 : vector<1x2048xf32>
    %cst = arith.constant 0.000000e+00 : f32
    %cst_2 = arith.constant 8.000000e+00 : f32
    %6 = vector.broadcast %cst : f32 to vector<1x2048xf32>
    %7 = arith.maximumf %6, %5 : vector<1x2048xf32>
    %8 = vector.broadcast %cst_2 : f32 to vector<1x2048xf32>
    %9 = arith.minimumf %8, %7 : vector<1x2048xf32>
    %10 = vector.broadcast %1 : f32 to vector<1x2048xf32>
    %11 = arith.mulf %9, %10 : vector<1x2048xf32>
    %c0_3 = arith.constant 0 : index
    %c0_4 = arith.constant 0 : index
    %12 = vector.load %arg3[%c0_3, %c0_4] : memref<1x2048xf32, #tpu.memory_space<vmem>>, vector<1x2048xf32>
    tpu.vector_store %arg3[%c0_3, %c0_4], %11 {strides = array<i32>} : memref<1x2048xf32, #tpu.memory_space<vmem>>, vector<1x2048xf32>,
    return
  }
  func.func @transform_0(%arg0: i32) -> i32 {
    %c0_i32 = arith.constant 0 : i32
    %c0_i32_0 = arith.constant 0 : i32
    return %c0_i32 : i32
  }
  func.func @transform_1(%arg0: i32) -> (i32, i32) {
    %c0_i32 = arith.constant 0 : i32
    %c0_i32_0 = arith.constant 0 : i32
    return %arg0, %c0_i32 : i32, i32
  }
  func.func @transform_2(%arg0: i32) -> (i32, i32) {
    %c0_i32 = arith.constant 0 : i32
    %c0_i32_0 = arith.constant 0 : i32
    return %arg0, %c0_i32 : i32, i32
  }
}

</mosaic_0001>

<bundles_post_ra>
// kernel: tpu_custom_call.1
= control target key start
LH: loop header
LB: loop body
LE: loop exit
PB: predicated region body
PF: predicated region fallthrough
CT: control target
= control target key end

     0   :  { %7 = vsyncpa [#allocation5], 0  ;;  %s172_s0 = inlined_call_operand.hbm [shape: f32[2], index: 0, kind: input, shape index: {}]   ;;  %s173_s1 = inlined_call_operand.hbm [shape: f32[1,2048], index: 1, kind: input, shape index: {}]   ;;  %s174_s2 = inlined_call_operand.hbm [shape: f32[1,2048], index: 2, kind: output, shape index: {}]  }
   0x1   :  { %8 = vsyncpa [#allocation3], 0 }
   0x2   :  { %9 = vsyncpa [#allocation4], 0  ;;  %s15_s11 = sshll.u32 %s172_s0, 4  ;;  %s24_s14 = sshll.u32 %s173_s1, 4  ;;  %s16_s11 = int_to_ptr.hbm [resolvable:$true] %s15_s11  ;;  %s25_s14 = int_to_ptr.hbm [resolvable:$true] %s24_s14 }
   0x3   :  { %s145_s15 = smov [#allocation2]   ;;  %s146_s16 = smov [#allocation6]  }
   0x4   :  { %18 = dma.hbm_to_smem %s16_s11, 16, %s145_s15, [#allocation5]  }
   0x5   :  { %s26_s17 = sshll.u32 %s146_s16, 4  ;;  %s27_s17 = int_to_ptr.vmem [resolvable:$true] %s26_s17 }
   0x6   :  { %29 = dma.hbm_to_vmem [thread:$0]  %s25_s14, 256, %s27_s17, [#allocation3]  }
   0x7   :  { %139 = dma.done.wait [#allocation5], 16  }
   0x8   :  { %140 = vsyncadd [#allocation5], 4294967280 }
   0x9   :  { %141 = dma.done.wait [#allocation3], 256  }
   0xa   :  { %142 = vsyncadd [#allocation3], 4294967040 }
   0xb   :  { %38 = sfence }
   0xc   :  { %s39_s18 = sld [smem:[#allocation2]]  ;;  %v41_v0 = vld [vmem:[#allocation6] sm:$0xff]  ;;  %v42_v1 = vld [vmem:[#allocation6 + $0x8] sm:$0xff]  ;;  %s147_s0 = smov [#allocation7]  }
   0xd   :  { %s75_s19 = sld [smem:[#allocation2 + $0x1]]  ;;  %s62_s1 = sshll.u32 %s147_s0, 4  ;;  %s63_s1 = int_to_ptr.vmem [resolvable:$true] %s62_s1 }
   0xe   :  { %s64_s22 = sshll.u32 %s174_s2, 4  ;;  %s65_s22 = int_to_ptr.hbm [resolvable:$true] %s64_s22 }
  0x12   :  { %v43_v2 = vstv %s39_s18 }
  0x13   :  { %v44_v3 = vmul.f32 %v43_v2, %v41_v0  ;;  %v45_v4 = vmul.f32 %v43_v2, %v42_v1  ;;  %v52_v9 = vstv %s75_s19 }
  0x15   :  { %v46_v5 = vfloor.f32 %v44_v3  ;;  %v47_v6 = vfloor.f32 %v45_v4 }
  0x17   :  { %v48_v7 = vmax.f32 %v46_v5, 0.0  ;;  %v49_v8 = vmax.f32 %v47_v6, 0.0 }
  0x19   :  { %v50_v10 = vmin.f32 %v48_v7, 8.0  ;;  %v51_v11 = vmin.f32 %v49_v8, 8.0 }
  0x1b   :  { %v53_v12 = vmul.f32 %v52_v9, %v50_v10  ;;  %v54_v13 = vmul.f32 %v52_v9, %v51_v11 }
  0x1d   :  { %55 = vst [vmem:[#allocation7] sm:$0xff] %v53_v12 }
  0x1e   :  { %56 = vst [vmem:[#allocation7 + $0x8] sm:$0xff] %v54_v13 }
  0x1f   :  { %67 = dma.vmem_to_hbm [thread:$0]  %s63_s1, 256, %s65_s22, [#allocation4]  }
  0x20   :  { %143 = dma.done.wait [#allocation4], 256  }
  0x21   :  { %144 = vsyncadd [#allocation4], 4294967040 }
  0x22   :  { %72 = vsyncpa [#allocation3], 1 }
  0x23   :  { %73 = vsyncpa [#allocation4], 1 }
  0x24   :  { %74 = vsyncpa [#allocation5], 1 }

</bundles_post_ra>
